<compile_context>
chip_gen: v6e
topology: v6e:2x2x1
jax: 0.10.0
libtpu: 0.0.40
codegen_flags: <defaults>
</compile_context>

<pallas_src>
from functools import partial

import jax
import jax.numpy as jnp
from jax.experimental import pallas as pl
from jax.experimental.pallas import tpu as pltpu

INPUT_DIM = 64    # sklearn digits: 8x8 images flattened
OUTPUT_DIM = 10   # 10 digit classes
HIDDEN = (64, 32, 32, 16)


def _mlp_kernel(x_ref,
                w1_ref, b1_ref,
                w2_ref, b2_ref,
                w3_ref, b3_ref,
                w45_ref, b45_ref,
                o_ref):
    """Fused 4-matmul MLP over one (TB, 64) batch tile. Weights are VMEM-resident."""
    # Cast to the matmul dtype in-kernel (no extra HBM pass in the wrapper).
    x = x_ref[...].astype(w1_ref.dtype)

    b1 = b1_ref[...]
    b2 = b2_ref[...]
    b3 = b3_ref[...]
    b45 = b45_ref[...]

    h = jnp.dot(x, w1_ref[...], preferred_element_type=jnp.float32) + b1
    h = jnp.maximum(h, 0.0)

    h = jnp.dot(h.astype(w2_ref.dtype), w2_ref[...],
                preferred_element_type=jnp.float32) + b2
    h = jnp.maximum(h, 0.0)

    h = jnp.dot(h.astype(w3_ref.dtype), w3_ref[...],
                preferred_element_type=jnp.float32) + b3
    h = jnp.maximum(h, 0.0)

    # linear4 @ linear5 pre-folded (no ReLU between them in the PyTorch forward).
    h = jnp.dot(h.astype(w45_ref.dtype), w45_ref[...],
                preferred_element_type=jnp.float32) + b45

    o_ref[...] = h.astype(o_ref.dtype)


@partial(jax.jit, static_argnames=("tile_batch", "use_bf16"))
def mlp_forward(x, params, *, tile_batch=2048, use_bf16=False):
    """x: [B, 64] float32. params: list of 5 (W [in,out], b [1,out]) pairs.

    tile_batch: batch rows per grid step (double-buffered DMA).  2048 rows of f32
    x is 512 KiB per buffer -> DMA time comfortably above the per-step overhead,
    still tiny vs the 32 MiB scoped-VMEM default.
    use_bf16: run the MXU in bf16 (x cast in-kernel, f32 accumulation kept).
    """
    B = x.shape[0]
    assert x.shape[1] == INPUT_DIM

    (w1, b1), (w2, b2), (w3, b3), (w4, b4), (w5, b5) = params

    # Fold linear4 + linear5: W45 = W4 @ W5 (32x10), b45 = b4 @ W5 + b5.
    w45 = w4 @ w5
    b45 = b4 @ w5 + b5

    mm_dtype = jnp.bfloat16 if use_bf16 else jnp.float32
    ws = [w.astype(mm_dtype) for w in (w1, w2, w3, w45)]
    bs = [b.astype(jnp.float32) for b in (b1, b2, b3, b45)]

    # Batch tile: large for HBM streaming, shrunk (8-aligned) for small batches.
    TB = min(tile_batch, max(8, ((B + 7) // 8) * 8))
    num_tiles = pl.cdiv(B, TB)
    Bp = TB * num_tiles

    xp = x  # keep f32 in HBM; kernel casts per-tile if bf16 is requested
    if Bp != B:
        xp = jnp.pad(xp, ((0, Bp - B), (0, 0)))

    flat_args = [xp]
    in_specs = [pl.BlockSpec((TB, INPUT_DIM), lambda i: (i, 0))]
    for w, b in zip(ws, bs):
        flat_args += [w, b]
        # Constant index maps -> weights/biases stay resident across grid steps.
        in_specs += [pl.BlockSpec(w.shape, lambda i: (0, 0)),
                     pl.BlockSpec(b.shape, lambda i: (0, 0))]

    param_bytes = sum(int(a.size) * a.dtype.itemsize for a in flat_args[1:])
    flops_per_row = 2 * (INPUT_DIM * 64 + 64 * 32 + 32 * 32 + 32 * OUTPUT_DIM)
    cost = pl.CostEstimate(
        flops=flops_per_row * Bp,
        transcendentals=0,
        bytes_accessed=Bp * INPUT_DIM * xp.dtype.itemsize
        + Bp * OUTPUT_DIM * 4
        + param_bytes,
    )

    # TODO(synk): output last dim (10) < 128 lanes -> masked vst; kept narrow on
    # purpose since the kernel is HBM-read bound and a 128-lane slab would write
    # 12.8x more output bytes.
    out = pl.pallas_call(
        _mlp_kernel,
        grid=(num_tiles,),
        in_specs=in_specs,
        out_specs=pl.BlockSpec((TB, OUTPUT_DIM), lambda i: (i, 0)),
        out_shape=jax.ShapeDtypeStruct((Bp, OUTPUT_DIM), jnp.float32),
        compiler_params=pltpu.CompilerParams(
            dimension_semantics=("parallel",),   # batch axis -> megacore on v7x
        ),
        cost_estimate=cost,
    )(*flat_args)

    return out[:B] if Bp != B else out


def init_params(key):
    """Deterministic init mimicking nn.Linear's uniform(-1/sqrt(fan_in), 1/sqrt(fan_in))."""
    dims = (INPUT_DIM,) + HIDDEN + (OUTPUT_DIM,)
    params = []
    for i in range(len(dims) - 1):
        fan_in, fan_out = dims[i], dims[i + 1]
        key, kw, kb = jax.random.split(key, 3)
        bound = 1.0 / jnp.sqrt(fan_in)
        w = jax.random.uniform(kw, (fan_in, fan_out), jnp.float32, -bound, bound)
        b = jax.random.uniform(kb, (1, fan_out), jnp.float32, -bound, bound)
        params.append((w, b))
    return params


def reference_forward(x, params):
    h = x
    for i, (w, b) in enumerate(params):
        h = h @ w + b
        if i < 3:  # ReLU after linear1..3 only
            h = jnp.maximum(h, 0.0)
    return h


if __name__ == "__main__":
    key = jax.random.PRNGKey(0)
    key, kx = jax.random.split(key)

    batch = 8
    x = jax.random.uniform(kx, (batch, INPUT_DIM), jnp.float32, 0.0, 16.0)

    params = init_params(key)
    ref = reference_forward(x, params)

    # f32 path (exact up to fp32 rounding of the linear4/5 fold).
    out = jax.block_until_ready(mlp_forward(x, params))
    assert out.shape == (batch, OUTPUT_DIM)
    assert jnp.allclose(out, ref, atol=1e-4, rtol=1e-4), "f32 mismatch vs JAX reference"

    # bf16 matmul-operand fast path (v6e/v7x); f32 accumulation, loose tolerance.
    out_bf16 = jax.block_until_ready(mlp_forward(x, params, use_bf16=True))
    assert jnp.allclose(out_bf16, ref, atol=5e-1, rtol=1e-1), "bf16 mismatch vs JAX reference"

    # Exercise the batch-tiled path with a non-multiple-of-8-friendly batch.
    key, kx2 = jax.random.split(key)
    x_big = jax.random.uniform(kx2, (1000, INPUT_DIM), jnp.float32, 0.0, 16.0)
    out_big = jax.block_until_ready(mlp_forward(x_big, params))
    ref_big = reference_forward(x_big, params)
    assert out_big.shape == (1000, OUTPUT_DIM)
    assert jnp.allclose(out_big, ref_big, atol=1e-4, rtol=1e-4), "tiled mismatch vs JAX reference"

    # Multi-grid-step + padding path (B > tile, not a tile multiple).
    key, kx3 = jax.random.split(key)
    x_huge = jax.random.uniform(kx3, (5000, INPUT_DIM), jnp.float32, 0.0, 16.0)
    out_huge = jax.block_until_ready(mlp_forward(x_huge, params, tile_batch=2048))
    ref_huge = reference_forward(x_huge, params)
    assert out_huge.shape == (5000, OUTPUT_DIM)
    assert jnp.allclose(out_huge, ref_huge, atol=1e-4, rtol=1e-4), "padded mismatch vs JAX reference"

    print("KERNEL_OK")
</pallas_src>

<mosaic_0001>
module attributes {stable_mosaic.version = 11 : i64} {
  func.func @_mlp_kernel(%arg0: i32, %arg1: memref<8x64xf32, #tpu.memory_space<vmem>>, %arg2: memref<64x64xf32, #tpu.memory_space<vmem>>, %arg3: memref<1x64xf32, #tpu.memory_space<vmem>>, %arg4: memref<64x32xf32, #tpu.memory_space<vmem>>, %arg5: memref<1x32xf32, #tpu.memory_space<vmem>>, %arg6: memref<32x32xf32, #tpu.memory_space<vmem>>, %arg7: memref<1x32xf32, #tpu.memory_space<vmem>>, %arg8: memref<32x10xf32, #tpu.memory_space<vmem>>, %arg9: memref<1x10xf32, #tpu.memory_space<vmem>>, %arg10: memref<8x10xf32, #tpu.memory_space<vmem>>) attributes {dimension_semantics = [#tpu.dimension_semantics<parallel>], iteration_bounds = array<i64: 1>, scalar_prefetch = 0 : i64, scratch_operands = 0 : i64, tpu.core_type = #tpu.core_type<tc>, window_params = [{transform_indices = @transform_0, window_bounds = array<i64: 8, 64>}, {pipeline_mode = #tpu.pipeline_mode<synchronous>, transform_indices = @transform_1, window_bounds = array<i64: 64, 64>}, {pipeline_mode = #tpu.pipeline_mode<synchronous>, transform_indices = @transform_2, window_bounds = array<i64: 1, 64>}, {pipeline_mode = #tpu.pipeline_mode<synchronous>, transform_indices = @transform_3, window_bounds = array<i64: 64, 32>}, {pipeline_mode = #tpu.pipeline_mode<synchronous>, transform_indices = @transform_4, window_bounds = array<i64: 1, 32>}, {pipeline_mode = #tpu.pipeline_mode<synchronous>, transform_indices = @transform_5, window_bounds = array<i64: 32, 32>}, {pipeline_mode = #tpu.pipeline_mode<synchronous>, transform_indices = @transform_6, window_bounds = array<i64: 1, 32>}, {pipeline_mode = #tpu.pipeline_mode<synchronous>, transform_indices = @transform_7, window_bounds = array<i64: 32, 10>}, {pipeline_mode = #tpu.pipeline_mode<synchronous>, transform_indices = @transform_8, window_bounds = array<i64: 1, 10>}, {transform_indices = @transform_9, window_bounds = array<i64: 8, 10>}]} {
    %c0 = arith.constant 0 : index
    %c0_0 = arith.constant 0 : index
    %0 = vector.load %arg1[%c0, %c0_0] : memref<8x64xf32, #tpu.memory_space<vmem>>, vector<8x64xf32>
    %c0_1 = arith.constant 0 : index
    %c0_2 = arith.constant 0 : index
    %1 = vector.load %arg3[%c0_1, %c0_2] : memref<1x64xf32, #tpu.memory_space<vmem>>, vector<1x64xf32>
    %c0_3 = arith.constant 0 : index
    %c0_4 = arith.constant 0 : index
    %2 = vector.load %arg5[%c0_3, %c0_4] : memref<1x32xf32, #tpu.memory_space<vmem>>, vector<1x32xf32>
    %c0_5 = arith.constant 0 : index
    %c0_6 = arith.constant 0 : index
    %3 = vector.load %arg7[%c0_5, %c0_6] : memref<1x32xf32, #tpu.memory_space<vmem>>, vector<1x32xf32>
    %c0_7 = arith.constant 0 : index
    %c0_8 = arith.constant 0 : index
    %4 = vector.load %arg9[%c0_7, %c0_8] : memref<1x10xf32, #tpu.memory_space<vmem>>, vector<1x10xf32>
    %c0_9 = arith.constant 0 : index
    %c0_10 = arith.constant 0 : index
    %5 = vector.load %arg2[%c0_9, %c0_10] : memref<64x64xf32, #tpu.memory_space<vmem>>, vector<64x64xf32>
    %cst = arith.constant dense<0.000000e+00> : vector<8x64xf32>
    %6 = tpu.matmul %0, %5, %cst {dimension_numbers = #tpu.dot_dimension_numbers<[1], [0], [0], [1], [0, 0, 1, 1], [], []>} : vector<8x64xf32>, vector<64x64xf32>, vector<8x64xf32> -> vector<8x64xf32>
    %7 = vector.broadcast %1 : vector<1x64xf32> to vector<8x64xf32>
    %8 = arith.addf %6, %7 : vector<8x64xf32>
    %cst_11 = arith.constant 0.000000e+00 : f32
    %9 = vector.broadcast %cst_11 : f32 to vector<8x64xf32>
    %10 = arith.maximumf %8, %9 : vector<8x64xf32>
    %c0_12 = arith.constant 0 : index
    %c0_13 = arith.constant 0 : index
    %11 = vector.load %arg4[%c0_12, %c0_13] : memref<64x32xf32, #tpu.memory_space<vmem>>, vector<64x32xf32>
    %cst_14 = arith.constant dense<0.000000e+00> : vector<8x32xf32>
    %12 = tpu.matmul %10, %11, %cst_14 {dimension_numbers = #tpu.dot_dimension_numbers<[1], [0], [0], [1], [0, 0, 1, 1], [], []>} : vector<8x64xf32>, vector<64x32xf32>, vector<8x32xf32> -> vector<8x32xf32>
    %13 = vector.broadcast %2 : vector<1x32xf32> to vector<8x32xf32>
    %14 = arith.addf %12, %13 : vector<8x32xf32>
    %cst_15 = arith.constant 0.000000e+00 : f32
    %15 = vector.broadcast %cst_15 : f32 to vector<8x32xf32>
    %16 = arith.maximumf %14, %15 : vector<8x32xf32>
    %c0_16 = arith.constant 0 : index
    %c0_17 = arith.constant 0 : index
    %17 = vector.load %arg6[%c0_16, %c0_17] : memref<32x32xf32, #tpu.memory_space<vmem>>, vector<32x32xf32>
    %cst_18 = arith.constant dense<0.000000e+00> : vector<8x32xf32>
    %18 = tpu.matmul %16, %17, %cst_18 {dimension_numbers = #tpu.dot_dimension_numbers<[1], [0], [0], [1], [0, 0, 1, 1], [], []>} : vector<8x32xf32>, vector<32x32xf32>, vector<8x32xf32> -> vector<8x32xf32>
    %19 = vector.broadcast %3 : vector<1x32xf32> to vector<8x32xf32>
    %20 = arith.addf %18, %19 : vector<8x32xf32>
    %cst_19 = arith.constant 0.000000e+00 : f32
    %21 = vector.broadcast %cst_19 : f32 to vector<8x32xf32>
    %22 = arith.maximumf %20, %21 : vector<8x32xf32>
    %c0_20 = arith.constant 0 : index
    %c0_21 = arith.constant 0 : index
    %23 = vector.load %arg8[%c0_20, %c0_21] : memref<32x10xf32, #tpu.memory_space<vmem>>, vector<32x10xf32>
    %cst_22 = arith.constant dense<0.000000e+00> : vector<8x10xf32>
    %24 = tpu.matmul %22, %23, %cst_22 {dimension_numbers = #tpu.dot_dimension_numbers<[1], [0], [0], [1], [0, 0, 1, 1], [], []>} : vector<8x32xf32>, vector<32x10xf32>, vector<8x10xf32> -> vector<8x10xf32>
    %25 = vector.broadcast %4 : vector<1x10xf32> to vector<8x10xf32>
    %26 = arith.addf %24, %25 : vector<8x10xf32>
    %c0_23 = arith.constant 0 : index
    %c0_24 = arith.constant 0 : index
    %27 = vector.load %arg10[%c0_23, %c0_24] : memref<8x10xf32, #tpu.memory_space<vmem>>, vector<8x10xf32>
    tpu.vector_store %arg10[%c0_23, %c0_24], %26 {strides = array<i32>} : memref<8x10xf32, #tpu.memory_space<vmem>>, vector<8x10xf32>,
    return
  }
  func.func @transform_0(%arg0: i32) -> (i32, i32) {
    %c0_i32 = arith.constant 0 : i32
    %c0_i32_0 = arith.constant 0 : i32
    return %arg0, %c0_i32 : i32, i32
  }
  func.func @transform_1(%arg0: i32) -> (i32, i32) {
    %c0_i32 = arith.constant 0 : i32
    %c0_i32_0 = arith.constant 0 : i32
    %c0_i32_1 = arith.constant 0 : i32
    return %c0_i32, %c0_i32_0 : i32, i32
  }
  func.func @transform_2(%arg0: i32) -> (i32, i32) {
    %c0_i32 = arith.constant 0 : i32
    %c0_i32_0 = arith.constant 0 : i32
    %c0_i32_1 = arith.constant 0 : i32
    return %c0_i32, %c0_i32_0 : i32, i32
  }
  func.func @transform_3(%arg0: i32) -> (i32, i32) {
    %c0_i32 = arith.constant 0 : i32
    %c0_i32_0 = arith.constant 0 : i32
    %c0_i32_1 = arith.constant 0 : i32
    return %c0_i32, %c0_i32_0 : i32, i32
  }
  func.func @transform_4(%arg0: i32) -> (i32, i32) {
    %c0_i32 = arith.constant 0 : i32
    %c0_i32_0 = arith.constant 0 : i32
    %c0_i32_1 = arith.constant 0 : i32
    return %c0_i32, %c0_i32_0 : i32, i32
  }
  func.func @transform_5(%arg0: i32) -> (i32, i32) {
    %c0_i32 = arith.constant 0 : i32
    %c0_i32_0 = arith.constant 0 : i32
    %c0_i32_1 = arith.constant 0 : i32
    return %c0_i32, %c0_i32_0 : i32, i32
  }
  func.func @transform_6(%arg0: i32) -> (i32, i32) {
    %c0_i32 = arith.constant 0 : i32
    %c0_i32_0 = arith.constant 0 : i32
    %c0_i32_1 = arith.constant 0 : i32
    return %c0_i32, %c0_i32_0 : i32, i32
  }
  func.func @transform_7(%arg0: i32) -> (i32, i32) {
    %c0_i32 = arith.constant 0 : i32
    %c0_i32_0 = arith.constant 0 : i32
    %c0_i32_1 = arith.constant 0 : i32
    return %c0_i32, %c0_i32_0 : i32, i32
  }
  func.func @transform_8(%arg0: i32) -> (i32, i32) {
    %c0_i32 = arith.constant 0 : i32
    %c0_i32_0 = arith.constant 0 : i32
    %c0_i32_1 = arith.constant 0 : i32
    return %c0_i32, %c0_i32_0 : i32, i32
  }
  func.func @transform_9(%arg0: i32) -> (i32, i32) {
    %c0_i32 = arith.constant 0 : i32
    %c0_i32_0 = arith.constant 0 : i32
    return %arg0, %c0_i32 : i32, i32
  }
}

</mosaic_0001>

<bundles_post_ra>
// kernel: mlp_forward.1
= control target key start
LH: loop header
LB: loop body
LE: loop exit
PB: predicated region body
PF: predicated region fallthrough
CT: control target
= control target key end

     0   :  { %v520_v1 = vmov 0.0   ;;  %vm521_vm0 = vmmov 0   ;;  %s699_s0 = inlined_call_operand.vmem [shape: f32[8,64], index: 0, kind: input, shape index: {}]   ;;  %s700_s1 = inlined_call_operand.vmem [shape: f32[64,64], index: 1, kind: input, shape index: {}]   ;;  %s701_s2 = inlined_call_operand.vmem [shape: f32[1,64], index: 2, kind: input, shape index: {}]   ;;  %s702_s3 = inlined_call_operand.vmem [shape: f32[64,32], index: 3, kind: input, shape index: {}]   ;;  %s703_s4 = inlined_call_operand.vmem [shape: f32[1,32], index: 4, kind: input, shape index: {}]   ;;  %s704_s5 = inlined_call_operand.vmem [shape: f32[32,32], index: 5, kind: input, shape index: {}]   ;;  %s705_s6 = inlined_call_operand.vmem [shape: f32[1,32], index: 6, kind: input, shape index: {}]   ;;  %s706_s7 = inlined_call_operand.vmem [shape: f32[32,10], index: 7, kind: input, shape index: {}]   ;;  %s707_s8 = inlined_call_operand.vmem [shape: f32[1,10], index: 8, kind: input, shape index: {}]   ;;  %s708_s9 = inlined_call_operand.hbm [shape: f32[8,10], index: 9, kind: output, shape index: {}]  }
   0x1   :  { %v45_v0 = vld [vmem:[%s700_s1 + $0x38] sm:$0xff]  ;;  %435 = vmatprep.subr.mxu0 %v520_v1  ;;  %v44_v2 = vld [vmem:[%s700_s1 + $0x30] sm:$0xff]  ;;  %451 = vmatprep.mubr.msk.f32.mxu0 %vm521_vm0, %v520_v1  ;;  %v43_v3 = vld [vmem:[%s700_s1 + $0x28] sm:$0xff] }
   0x2   :  { %436 = vmatpush3.msra.mxu0 %v45_v0  ;;  %454 = vmatprep.subr.mxu1 %v520_v1  ;;  %v134_v4 = vld [vmem:[%s702_s3 + $0x38] sm:$0xff]  ;;  %v133_v5 = vld [vmem:[%s702_s3 + $0x30] sm:$0xff]  ;;  %v42_v6 = vld [vmem:[%s700_s1 + $0x20] sm:$0xff] }
   0x3   :  { %437 = vmatprep.subr.mxu0 %v520_v1  ;;  %470 = vmatprep.mubr.msk.f32.mxu1 %vm521_vm0, %v520_v1  ;;  %v132_v7 = vld [vmem:[%s702_s3 + $0x28] sm:$0xff] }
   0x4   :  { %438 = vmatpush3.msra.mxu0 %v44_v2  ;;  %455 = vmatpush3.msra.mxu1 %v134_v4 }
   0x5   :  { %439 = vmatprep.subr.mxu0 %v520_v1  ;;  %456 = vmatprep.subr.mxu1 %v520_v1 }
   0x6   :  { %14 = vsyncpa [#allocation3], 0  ;;  %440 = vmatpush3.msra.mxu0 %v43_v3  ;;  %457 = vmatpush3.msra.mxu1 %v133_v5  ;;  %v41_v8 = vld [vmem:[%s700_s1 + $0x18] sm:$0xff]  ;;  %v131_v9 = vld [vmem:[%s702_s3 + $0x20] sm:$0xff]  ;;  %vm52_vm1 = vcmask 523264   ;;  %vm225_vm2 = vcmask 261120  }
   0x7   :  { %441 = vmatprep.subr.mxu0 %v520_v1  ;;  %458 = vmatprep.subr.mxu1 %v520_v1  ;;  %v40_v10 = vld [vmem:[%s700_s1 + $0x10] sm:$0xff]  ;;  %v130_v11 = vld [vmem:[%s702_s3 + $0x18] sm:$0xff]  ;;  %v39_v12 = vld [vmem:[%s700_s1 + $0x8] sm:$0xff]  ;;  %vm383_vm3 = vcmask 80896  }
   0x8   :  { %442 = vmatpush3.msra.mxu0 %v42_v6  ;;  %459 = vmatpush3.msra.mxu1 %v132_v7  ;;  %v38_v13 = vld [vmem:[%s700_s1] sm:$0xff]  ;;  %v129_v15 = vld [vmem:[%s702_s3 + $0x10] sm:$0xff]  ;;  %v128_v16 = vld [vmem:[%s702_s3 + $0x8] sm:$0xff] }
   0x9   :  { %443 = vmatprep.subr.mxu0 %v520_v1  ;;  %460 = vmatprep.subr.mxu1 %v520_v1  ;;  %v33_v14 = vld [vmem:[%s699_s0] sm:$0xff]  ;;  %v218_v18 = vld [vmem:[%s704_s5 + $0x18] sm:$0xff]  ;;  %v217_v24 = vld [vmem:[%s704_s5 + $0x10] sm:$0xff]  ;;  %s522_s0 = smov [#allocation2]  }
   0xa   :  { %444 = vmatpush3.msra.mxu0 %v41_v8  ;;  %461 = vmatpush3.msra.mxu1 %v131_v9  ;;  %v127_v17 = vld [vmem:[%s702_s3] sm:$0xff]  ;;  %v216_v25 = vld [vmem:[%s704_s5 + $0x8] sm:$0xff]  ;;  %v303_v27 = vld [vmem:[%s706_s7 + $0x18] sm:$0xff]  ;;  %s391_s18 = sshll.u32 %s522_s0, 4  ;;  %s392_s18 = int_to_ptr.vmem [resolvable:$true] %s391_s18 }
   0xb   :  { %445 = vmatprep.subr.mxu0 %v520_v1  ;;  %462 = vmatprep.subr.mxu1 %v520_v1  ;;  %v399_v19 = vld [vmem:[%s701_s2] ss:$0 sm:$0xff]  ;;  %v302_v33 = vld [vmem:[%s706_s7 + $0x10] sm:$0xff]  ;;  %v301_v34 = vld [vmem:[%s706_s7 + $0x8] sm:$0xff]  ;;  %p503_p1 = scmp.lt.s32.totalorder %s392_s18, %s392_s18 }
   0xc   :  { %446 = vmatpush3.msra.mxu0 %v40_v10  ;;  %463 = vmatpush3.msra.mxu1 %v130_v11  ;;  %v215_v26 = vld [vmem:[%s704_s5] sm:$0xff] }
   0xd   :  { %447 = vmatprep.subr.mxu0 %v520_v1  ;;  %464 = vmatprep.subr.mxu1 %v520_v1  ;;  %v401_v28 = vld [vmem:[%s703_s4] ss:$0 sm:$0xff] }
   0xe   :  { %448 = vmatpush3.msra.mxu0 %v39_v12  ;;  %465 = vmatpush3.msra.mxu1 %v129_v15  ;;  %v300_v35 = vld [vmem:[%s706_s7] sm:$0xff]  ;;  %s498_s7 = scalar_lea.vmem %s392_s18, 128 }
   0xf   :  { %449 = vmatprep.subr.mxu0 %v520_v1  ;;  %466 = vmatprep.subr.mxu1 %v520_v1  ;;  %v403_v36 = vld [vmem:[%s705_s6] ss:$0 sm:$0xff]  ;;  %p499_p0 = scmp.ne.s32.totalorder %s392_s18, %s498_s7  ;;  %p504_p2 = scmp.lt.s32.totalorder %s498_s7, %s498_s7 }
  0x10   :  { %450 = vmatpush3.msra.mxu0 %v38_v13  ;;  %467 = vmatpush3.msra.mxu1 %v128_v16  ;;  %v405_v41 = vld [vmem:[%s707_s8] ss:$0 sm:$0xff] }
  0x11   :  { %452 = vmatmul.mubr.msk.f32.vlgmr.msra.gmra.mxu0 %vm52_vm1, %v33_v14  ;;  %473 = vmatprep.subr.mxu0 %v520_v1  ;;  %p505_p3 = por %p504_p2, %p503_p1 }
  0x12   :  { %481 = vmatprep.mubr.msk.f32.mxu0 %vm521_vm0, %v520_v1  ;;  %468 = vmatprep.subr.mxu1 %v520_v1 }
  0x13   :  { %469 = vmatpush3.msra.mxu1 %v127_v17  ;;  %474 = vmatpush3.msra.mxu0 %v218_v18  ;;  %p506_p4 = pnand %p505_p3, %p499_p0 }
  0x14   :  { %484 = vmatprep.subr.mxu1 %v520_v1  ;;  %475 = vmatprep.subr.mxu0 %v520_v1 }
  0x15   :  { %476 = vmatpush3.msra.mxu0 %v217_v24 }
  0x16   :  { %477 = vmatprep.subr.mxu0 %v520_v1 }
  0x17   :  { %478 = vmatpush3.msra.mxu0 %v216_v25 }
  0x18   :  { %479 = vmatprep.subr.mxu0 %v520_v1 }
  0x19   :  { %480 = vmatpush3.msra.mxu0 %v215_v26 }
  0xd1   :  { %v122_v20 = vpop.f32.mrf.mxu0 }
  0xd2   :  { %v123_v21 = vadd.f32 %v399_v19, %v122_v20 }
  0xd3   :  { %v453_v22 = vpop.f32.mrf.mxu0 }
  0xd4   :  { %v126_v23 = vmax.f32 %v123_v21, 0.0 }
  0xd6   :  { %471 = vmatmul.mubr.msk.f32.vlgmr.msra.gmra.mxu1 %vm52_vm1, %v126_v23 }
  0xd7   :  { %492 = vmatprep.mubr.msk.f32.mxu1 %vm521_vm0, %v520_v1  ;;  %485 = vmatpush3.msra.mxu1 %v303_v27 }
  0xd8   :  { %486 = vmatprep.subr.mxu1 %v520_v1 }
  0xd9   :  { %487 = vmatpush3.msra.mxu1 %v302_v33 }
  0xda   :  { %488 = vmatprep.subr.mxu1 %v520_v1 }
  0xdb   :  { %489 = vmatpush3.msra.mxu1 %v301_v34 }
  0xdc   :  { %490 = vmatprep.subr.mxu1 %v520_v1 }
  0xdd   :  { %491 = vmatpush3.msra.mxu1 %v300_v35 }
 0x196   :  { %v210_v29 = vpop.f32.mrf.mxu1 }
 0x197   :  { %v211_v30 = vadd.f32 %v401_v28, %v210_v29 }
 0x198   :  { %v472_v31 = vpop.f32.mrf.mxu1 }
 0x199   :  { %v214_v32 = vmax.f32 %v211_v30, 0.0 }
 0x19b   :  { %482 = vmatmul.mubr.msk.f32.vlgmr.msra.gmra.mxu0 %vm225_vm2, %v214_v32 }
 0x25b   :  { %v295_v37 = vpop.f32.mrf.mxu0 }
 0x25c   :  { %v296_v38 = vadd.f32 %v403_v36, %v295_v37 }
 0x25d   :  { %v483_v39 = vpop.f32.mrf.mxu0 }
 0x25e   :  { %v299_v40 = vmax.f32 %v296_v38, 0.0 }
 0x260   :  { %493 = vmatmul.mubr.msk.f32.vlgmr.msra.gmra.mxu1 %vm225_vm2, %v299_v40 }
 0x320   :  { %v379_v42 = vpop.f32.mrf.mxu1 }
 0x321   :  { %v380_v43 = vadd.f32 %v405_v41, %v379_v42 }
 0x322   :  { %v494_v44 = vpop.f32.mrf.mxu1 }
 0x323   :  { %384 = vst.msk [vmem:[#allocation2] sm:$0xff] %vm383_vm3, %v380_v43 }
 0x324   :  { %509 = shalt.err (!%p506_p4)
}
 0x325   :  { %394 = dma.vmem_to_hbm [thread:$0]  %s392_s18, 128, %s708_s9, [#allocation3]  }
 0x326   :  { %518 = dma.done.wait [#allocation3], 128  }
 0x327   :  { %519 = vsyncadd [#allocation3], 4294967168 }
 0x328   :  { %398 = vsyncpa [#allocation3], 1 }

</bundles_post_ra>
